<compile_context>
chip_gen: v5e
topology: v5e:2x2
jax: 0.10.0
libtpu: 0.0.40
codegen_flags: <defaults>
</compile_context>

<pallas_src>
import functools

import jax
import jax.numpy as jnp
from jax.experimental import pallas as pl
from jax.experimental.pallas import tpu as pltpu

_NUM_CORES = 2        # leading "parallel" grid axis (v7x megacore split; harmless on 1-TC chips)
_SLABS_PER_CORE = 4   # concurrent DMA streams issued per core


def _sublane_rows(dtype) -> int:
    """Second-minor (row) tiling granularity for the given element width."""
    return {4: 8, 2: 16, 1: 32}.get(jnp.dtype(dtype).itemsize, 8)


def _round_up(x: int, m: int) -> int:
    return ((x + m - 1) // m) * m


@functools.lru_cache(maxsize=None)
def _build_copy(n: int, dtype_name: str, num_cores: int, slabs_per_core: int,
                donate: bool):
    """Builds (and jits) the direct HBM->HBM DMA copy for an (n, n) array."""
    dtype = jnp.dtype(dtype_name)
    itemsize = dtype.itemsize
    sublane = _sublane_rows(dtype)

    # Static row-slab plan: (start, rows, owner_core).  Slab starts/sizes are
    # multiples of the sublane granularity (except a final remainder slab) so
    # each DMA moves whole HBM tiles; every slab keeps the full lane-dense row.
    rows_per_slab = _round_up(pl.cdiv(n, num_cores * slabs_per_core), sublane)
    slabs = []
    start = 0
    while start < n:
        rows = min(rows_per_slab, n - start)
        slabs.append((start, rows, len(slabs) % num_cores))
        start += rows
    num_slabs = len(slabs)

    def kernel(in_hbm, out_hbm, sems):
        core = pl.program_id(0)
        for owner in range(num_cores):
            mine = [(i, s, r) for i, (s, r, o) in enumerate(slabs) if o == owner]
            if not mine:
                continue

            @pl.when(core == owner)
            def _(mine=mine):
                copies = [
                    pltpu.make_async_copy(
                        in_hbm.at[pl.ds(s, r)],
                        out_hbm.at[pl.ds(s, r)],
                        sems.at[i],
                    )
                    for i, s, r in mine
                ]
                for cp in copies:   # launch all of this core's DMAs ...
                    cp.start()
                for cp in copies:   # ... then drain them.
                    cp.wait()

    call = pl.pallas_call(
        kernel,
        out_shape=jax.ShapeDtypeStruct((n, n), dtype),
        grid=(num_cores,),
        in_specs=[pl.BlockSpec(memory_space=pl.ANY)],
        out_specs=pl.BlockSpec(memory_space=pl.ANY),
        scratch_shapes=[pltpu.SemaphoreType.DMA((num_slabs,))],
        compiler_params=pltpu.CompilerParams(
            dimension_semantics=("parallel",),
        ),
        cost_estimate=pl.CostEstimate(
            flops=0, transcendentals=0, bytes_accessed=2 * n * n * itemsize),
        input_output_aliases=({0: 0} if donate else {}),
    )
    return jax.jit(call)


def estimate_adj_forward(estimated_adj: jax.Array, *, donate: bool = False) -> jax.Array:
    """Pallas implementation of EstimateAdj.forward().

    Returns the (n, n) parameter, materialized via a direct HBM->HBM DMA copy
    (no VMEM staging).  Set donate=True only when the caller runs under jit
    with a donated parameter — the input_output_aliases then lets XLA elide
    the copy entirely.  (The zero-cost forward is simply returning the array.)
    """
    n, n2 = estimated_adj.shape
    assert n == n2, "estimated_adj must be square"
    fn = _build_copy(n, jnp.dtype(estimated_adj.dtype).name,
                     _NUM_CORES, _SLABS_PER_CORE, donate)
    return fn(estimated_adj)


class EstimateAdjJax:
    """JAX mirror of the PyTorch EstimateAdj module (forward pass only)."""

    def __init__(self, adj: jax.Array, symmetric: bool = False):
        n = adj.shape[0]
        assert adj.shape == (n, n)
        # _init_estimation: copy the (dense) adjacency into the parameter.
        self.estimated_adj = jnp.asarray(adj, dtype=jnp.float32)
        self.symmetric = symmetric  # unused in forward(), kept for parity

    def __call__(self, *, zero_copy: bool = False, donate: bool = False) -> jax.Array:
        # Optimal forward is the identity on the parameter (zero HBM traffic).
        if zero_copy:
            return self.estimated_adj
        # Pallas direct-DMA copy path (materializes a fresh output buffer).
        return estimate_adj_forward(self.estimated_adj, donate=donate)


if __name__ == "__main__":
    key = jax.random.PRNGKey(0)

    # --- Case 1: small graph (n = 32), 4 sublane-aligned slabs across both
    # --- owners of the parallel axis. ---
    n = 32
    logits = jax.random.uniform(key, (n, n))
    adj = (logits < 0.2).astype(jnp.float32)
    adj = jnp.maximum(adj, adj.T)
    adj = adj * (1.0 - jnp.eye(n, dtype=jnp.float32))

    model = EstimateAdjJax(adj, symmetric=False)
    out = jax.block_until_ready(model())
    assert out.shape == (n, n)
    assert out.dtype == jnp.float32
    assert bool(jnp.array_equal(out, model.estimated_adj))

    # Second call hits the lru/jit cache (no re-trace).
    out_again = jax.block_until_ready(model())
    assert bool(jnp.array_equal(out_again, model.estimated_adj))

    # --- Case 2: ragged n (not a multiple of 8/128) -> exercises the partial
    # --- final slab and round-robin core ownership. ---
    n2 = 100
    adj2 = (jax.random.uniform(jax.random.PRNGKey(0), (n2, n2)) < 0.1).astype(jnp.float32)
    out2 = jax.block_until_ready(estimate_adj_forward(adj2))
    assert out2.shape == (n2, n2)
    assert bool(jnp.array_equal(out2, adj2))

    print("KERNEL_OK")
</pallas_src>

<mosaic_0001>
module attributes {stable_mosaic.version = 11 : i64} {
  func.func @kernel(%arg0: i32, %arg1: memref<32x32xf32, #tpu.memory_space<any>>, %arg2: memref<32x32xf32, #tpu.memory_space<any>>, %arg3: memref<4x!tpu.dma_semaphore, #tpu.memory_space<semaphore_mem>>) attributes {dimension_semantics = [#tpu.dimension_semantics<parallel>], iteration_bounds = array<i64: 2>, scalar_prefetch = 0 : i64, scratch_operands = 1 : i64, tpu.core_type = #tpu.core_type<tc>, window_params = [{}, {}]} {
    %c0_i32 = arith.constant 0 : i32
    %0 = arith.cmpi eq, %arg0, %c0_i32 : i32
    %1 = arith.extui %0 : i1 to i32
    %c0_i32_0 = arith.constant 0 : i32
    %2 = arith.cmpi ne, %1, %c0_i32_0 : i32
    scf.if %2 {
      %c0_i32_2 = arith.constant 0 : i32
      %c0_i32_3 = arith.constant 0 : i32
      %c0_i32_4 = arith.constant 0 : i32
      %6 = tpu.memref_slice %arg1[%c0_i32_3, %c0_i32_4] : memref<32x32xf32, #tpu.memory_space<any>> -> memref<8x32xf32, #tpu.memory_space<any>>
      %c0_i32_5 = arith.constant 0 : i32
      %c0_i32_6 = arith.constant 0 : i32
      %7 = tpu.memref_slice %arg2[%c0_i32_5, %c0_i32_6] : memref<32x32xf32, #tpu.memory_space<any>> -> memref<8x32xf32, #tpu.memory_space<any>>
      %8 = tpu.memref_slice %arg3[%c0_i32_2] : memref<4x!tpu.dma_semaphore, #tpu.memory_space<semaphore_mem>> -> memref<1x!tpu.dma_semaphore, #tpu.memory_space<semaphore_mem>>
      %9 = tpu.memref_squeeze %8 : memref<1x!tpu.dma_semaphore, #tpu.memory_space<semaphore_mem>> -> memref<!tpu.dma_semaphore, #tpu.memory_space<semaphore_mem>>
      tpu.enqueue_dma source(%6 : memref<8x32xf32, #tpu.memory_space<any>>) target(%7 : memref<8x32xf32, #tpu.memory_space<any>>) target_semaphore(%9 : memref<!tpu.dma_semaphore, #tpu.memory_space<semaphore_mem>>)
      %c2_i32 = arith.constant 2 : i32
      %c16_i32 = arith.constant 16 : i32
      %c0_i32_7 = arith.constant 0 : i32
      %10 = tpu.memref_slice %arg1[%c16_i32, %c0_i32_7] : memref<32x32xf32, #tpu.memory_space<any>> -> memref<8x32xf32, #tpu.memory_space<any>>
      %c16_i32_8 = arith.constant 16 : i32
      %c0_i32_9 = arith.constant 0 : i32
      %11 = tpu.memref_slice %arg2[%c16_i32_8, %c0_i32_9] : memref<32x32xf32, #tpu.memory_space<any>> -> memref<8x32xf32, #tpu.memory_space<any>>
      %12 = tpu.memref_slice %arg3[%c2_i32] : memref<4x!tpu.dma_semaphore, #tpu.memory_space<semaphore_mem>> -> memref<1x!tpu.dma_semaphore, #tpu.memory_space<semaphore_mem>>
      %13 = tpu.memref_squeeze %12 : memref<1x!tpu.dma_semaphore, #tpu.memory_space<semaphore_mem>> -> memref<!tpu.dma_semaphore, #tpu.memory_space<semaphore_mem>>
      tpu.enqueue_dma source(%10 : memref<8x32xf32, #tpu.memory_space<any>>) target(%11 : memref<8x32xf32, #tpu.memory_space<any>>) target_semaphore(%13 : memref<!tpu.dma_semaphore, #tpu.memory_space<semaphore_mem>>)
      %c0_i32_10 = arith.constant 0 : i32
      %c0_i32_11 = arith.constant 0 : i32
      %c0_i32_12 = arith.constant 0 : i32
      %14 = tpu.memref_slice %arg1[%c0_i32_11, %c0_i32_12] : memref<32x32xf32, #tpu.memory_space<any>> -> memref<8x32xf32, #tpu.memory_space<any>>
      %c0_i32_13 = arith.constant 0 : i32
      %c0_i32_14 = arith.constant 0 : i32
      %15 = tpu.memref_slice %arg2[%c0_i32_13, %c0_i32_14] : memref<32x32xf32, #tpu.memory_space<any>> -> memref<8x32xf32, #tpu.memory_space<any>>
      %16 = tpu.memref_slice %arg3[%c0_i32_10] : memref<4x!tpu.dma_semaphore, #tpu.memory_space<semaphore_mem>> -> memref<1x!tpu.dma_semaphore, #tpu.memory_space<semaphore_mem>>
      %17 = tpu.memref_squeeze %16 : memref<1x!tpu.dma_semaphore, #tpu.memory_space<semaphore_mem>> -> memref<!tpu.dma_semaphore, #tpu.memory_space<semaphore_mem>>
      tpu.wait_dma2 semaphore(%17 : memref<!tpu.dma_semaphore, #tpu.memory_space<semaphore_mem>>) src(%14 : memref<8x32xf32, #tpu.memory_space<any>>) dst(%15 : memref<8x32xf32, #tpu.memory_space<any>>)
      %c2_i32_15 = arith.constant 2 : i32
      %c16_i32_16 = arith.constant 16 : i32
      %c0_i32_17 = arith.constant 0 : i32
      %18 = tpu.memref_slice %arg1[%c16_i32_16, %c0_i32_17] : memref<32x32xf32, #tpu.memory_space<any>> -> memref<8x32xf32, #tpu.memory_space<any>>
      %c16_i32_18 = arith.constant 16 : i32
      %c0_i32_19 = arith.constant 0 : i32
      %19 = tpu.memref_slice %arg2[%c16_i32_18, %c0_i32_19] : memref<32x32xf32, #tpu.memory_space<any>> -> memref<8x32xf32, #tpu.memory_space<any>>
      %20 = tpu.memref_slice %arg3[%c2_i32_15] : memref<4x!tpu.dma_semaphore, #tpu.memory_space<semaphore_mem>> -> memref<1x!tpu.dma_semaphore, #tpu.memory_space<semaphore_mem>>
      %21 = tpu.memref_squeeze %20 : memref<1x!tpu.dma_semaphore, #tpu.memory_space<semaphore_mem>> -> memref<!tpu.dma_semaphore, #tpu.memory_space<semaphore_mem>>
      tpu.wait_dma2 semaphore(%21 : memref<!tpu.dma_semaphore, #tpu.memory_space<semaphore_mem>>) src(%18 : memref<8x32xf32, #tpu.memory_space<any>>) dst(%19 : memref<8x32xf32, #tpu.memory_space<any>>)
    } else {
    }
    %c1_i32 = arith.constant 1 : i32
    %3 = arith.cmpi eq, %arg0, %c1_i32 : i32
    %4 = arith.extui %3 : i1 to i32
    %c0_i32_1 = arith.constant 0 : i32
    %5 = arith.cmpi ne, %4, %c0_i32_1 : i32
    scf.if %5 {
      %c1_i32_2 = arith.constant 1 : i32
      %c8_i32 = arith.constant 8 : i32
      %c0_i32_3 = arith.constant 0 : i32
      %6 = tpu.memref_slice %arg1[%c8_i32, %c0_i32_3] : memref<32x32xf32, #tpu.memory_space<any>> -> memref<8x32xf32, #tpu.memory_space<any>>
      %c8_i32_4 = arith.constant 8 : i32
      %c0_i32_5 = arith.constant 0 : i32
      %7 = tpu.memref_slice %arg2[%c8_i32_4, %c0_i32_5] : memref<32x32xf32, #tpu.memory_space<any>> -> memref<8x32xf32, #tpu.memory_space<any>>
      %8 = tpu.memref_slice %arg3[%c1_i32_2] : memref<4x!tpu.dma_semaphore, #tpu.memory_space<semaphore_mem>> -> memref<1x!tpu.dma_semaphore, #tpu.memory_space<semaphore_mem>>
      %9 = tpu.memref_squeeze %8 : memref<1x!tpu.dma_semaphore, #tpu.memory_space<semaphore_mem>> -> memref<!tpu.dma_semaphore, #tpu.memory_space<semaphore_mem>>
      tpu.enqueue_dma source(%6 : memref<8x32xf32, #tpu.memory_space<any>>) target(%7 : memref<8x32xf32, #tpu.memory_space<any>>) target_semaphore(%9 : memref<!tpu.dma_semaphore, #tpu.memory_space<semaphore_mem>>)
      %c3_i32 = arith.constant 3 : i32
      %c24_i32 = arith.constant 24 : i32
      %c0_i32_6 = arith.constant 0 : i32
      %10 = tpu.memref_slice %arg1[%c24_i32, %c0_i32_6] : memref<32x32xf32, #tpu.memory_space<any>> -> memref<8x32xf32, #tpu.memory_space<any>>
      %c24_i32_7 = arith.constant 24 : i32
      %c0_i32_8 = arith.constant 0 : i32
      %11 = tpu.memref_slice %arg2[%c24_i32_7, %c0_i32_8] : memref<32x32xf32, #tpu.memory_space<any>> -> memref<8x32xf32, #tpu.memory_space<any>>
      %12 = tpu.memref_slice %arg3[%c3_i32] : memref<4x!tpu.dma_semaphore, #tpu.memory_space<semaphore_mem>> -> memref<1x!tpu.dma_semaphore, #tpu.memory_space<semaphore_mem>>
      %13 = tpu.memref_squeeze %12 : memref<1x!tpu.dma_semaphore, #tpu.memory_space<semaphore_mem>> -> memref<!tpu.dma_semaphore, #tpu.memory_space<semaphore_mem>>
      tpu.enqueue_dma source(%10 : memref<8x32xf32, #tpu.memory_space<any>>) target(%11 : memref<8x32xf32, #tpu.memory_space<any>>) target_semaphore(%13 : memref<!tpu.dma_semaphore, #tpu.memory_space<semaphore_mem>>)
      %c1_i32_9 = arith.constant 1 : i32
      %c8_i32_10 = arith.constant 8 : i32
      %c0_i32_11 = arith.constant 0 : i32
      %14 = tpu.memref_slice %arg1[%c8_i32_10, %c0_i32_11] : memref<32x32xf32, #tpu.memory_space<any>> -> memref<8x32xf32, #tpu.memory_space<any>>
      %c8_i32_12 = arith.constant 8 : i32
      %c0_i32_13 = arith.constant 0 : i32
      %15 = tpu.memref_slice %arg2[%c8_i32_12, %c0_i32_13] : memref<32x32xf32, #tpu.memory_space<any>> -> memref<8x32xf32, #tpu.memory_space<any>>
      %16 = tpu.memref_slice %arg3[%c1_i32_9] : memref<4x!tpu.dma_semaphore, #tpu.memory_space<semaphore_mem>> -> memref<1x!tpu.dma_semaphore, #tpu.memory_space<semaphore_mem>>
      %17 = tpu.memref_squeeze %16 : memref<1x!tpu.dma_semaphore, #tpu.memory_space<semaphore_mem>> -> memref<!tpu.dma_semaphore, #tpu.memory_space<semaphore_mem>>
      tpu.wait_dma2 semaphore(%17 : memref<!tpu.dma_semaphore, #tpu.memory_space<semaphore_mem>>) src(%14 : memref<8x32xf32, #tpu.memory_space<any>>) dst(%15 : memref<8x32xf32, #tpu.memory_space<any>>)
      %c3_i32_14 = arith.constant 3 : i32
      %c24_i32_15 = arith.constant 24 : i32
      %c0_i32_16 = arith.constant 0 : i32
      %18 = tpu.memref_slice %arg1[%c24_i32_15, %c0_i32_16] : memref<32x32xf32, #tpu.memory_space<any>> -> memref<8x32xf32, #tpu.memory_space<any>>
      %c24_i32_17 = arith.constant 24 : i32
      %c0_i32_18 = arith.constant 0 : i32
      %19 = tpu.memref_slice %arg2[%c24_i32_17, %c0_i32_18] : memref<32x32xf32, #tpu.memory_space<any>> -> memref<8x32xf32, #tpu.memory_space<any>>
      %20 = tpu.memref_slice %arg3[%c3_i32_14] : memref<4x!tpu.dma_semaphore, #tpu.memory_space<semaphore_mem>> -> memref<1x!tpu.dma_semaphore, #tpu.memory_space<semaphore_mem>>
      %21 = tpu.memref_squeeze %20 : memref<1x!tpu.dma_semaphore, #tpu.memory_space<semaphore_mem>> -> memref<!tpu.dma_semaphore, #tpu.memory_space<semaphore_mem>>
      tpu.wait_dma2 semaphore(%21 : memref<!tpu.dma_semaphore, #tpu.memory_space<semaphore_mem>>) src(%18 : memref<8x32xf32, #tpu.memory_space<any>>) dst(%19 : memref<8x32xf32, #tpu.memory_space<any>>)
    } else {
    }
    return
  }
}

</mosaic_0001>

<bundles_post_ra>
// kernel: tpu_custom_call.1
= control target key start
LH: loop header
LB: loop body
LE: loop exit
PB: predicated region body
PF: predicated region fallthrough
CT: control target
= control target key end

     0   :  { %s194_s6 = smov 0   ;;  %s256_s0 = inlined_call_operand.hbm [shape: f32[32,32], index: 0, kind: input, shape index: {}]   ;;  %s257_s1 = inlined_call_operand.hbm [shape: f32[32,32], index: 1, kind: output, shape index: {}]  }
   0x1 LB: > { %s21_s9 = sshll.u32 %s256_s0, 4  ;;  %p132_p0 = scmp.eq.s32.totalorder %s173_s6, 0  ;;  %s173_s6 = sphi %s194_s6, %s11_s6   ;;  %s22_s9 = int_to_ptr.hbm [resolvable:$true] %s21_s9 }
   0x2   : > { %s23_s12 = sshll.u32 %s257_s1, 4  ;;  %s28_s15 = scalar_lea.hbm %s256_s0, 16  ;;  %s24_s12 = int_to_ptr.hbm [resolvable:$true] %s23_s12 }
   0x3   : > { %s175_s16 = smov [#allocation2]   ;;  %s176_s17 = smov [#allocation3]  }
   0x4   : > { %s177_s18 = smov 0   ;;  %s29_s21 = scalar_lea.hbm %s257_s1, 16 }
   0x5   : > { %123 = dma.general (%p132_p0), %s22_s9, 128, %s24_s12, %s175_s16, %s176_s17, [#allocation4], %s177_s18, 0  }
   0x6   : > { %s35_s22 = sshll.u32 %s28_s15, 4  ;;  %s37_s23 = sshll.u32 %s29_s21, 4  ;;  %s36_s22 = int_to_ptr.hbm [resolvable:$true] %s35_s22  ;;  %s38_s23 = int_to_ptr.hbm [resolvable:$true] %s37_s23 }
   0x7   : > { %s178_s24 = smov [#allocation2 + $0x2]   ;;  %s179_s25 = smov [#allocation5]  }
   0x8   : > { %124 = dma.general (%p132_p0), %s36_s22, 128, %s38_s23, %s178_s24, %s179_s25, [#allocation6], %s177_s18, 0  }
   0x9   : > { %156 = dma.done.wait (%p132_p0), [#allocation2], 128 }
   0xa   : > { %158 = vsyncadd (%p132_p0), [#allocation2], 4294967168 }
   0xb   : > { %160 = dma.done.wait (%p132_p0), [#allocation2 + $0x2], 128 }
   0xc   : > { %162 = vsyncadd (%p132_p0), [#allocation2 + $0x2], 4294967168  ;;  %p133_p1 = scmp.eq.s32.totalorder %s173_s6, 1  ;;  %s51_s28 = scalar_lea.hbm %s256_s0, 8 }
   0xd   : > { %s52_s2 = scalar_lea.hbm %s257_s1, 8  ;;  %s58_s3 = sshll.u32 %s51_s28, 4  ;;  %s59_s3 = int_to_ptr.hbm [resolvable:$true] %s58_s3 }
   0xe   : > { %s60_s4 = sshll.u32 %s52_s2, 4  ;;  %s180_s5 = smov [#allocation2 + $0x1]   ;;  %s61_s4 = int_to_ptr.hbm [resolvable:$true] %s60_s4 }
   0xf   : > { %s181_s7 = smov [#allocation7]   ;;  %s65_s10 = scalar_lea.hbm %s256_s0, 24 }
  0x10   : > { %128 = dma.general (%p133_p1), %s59_s3, 128, %s61_s4, %s180_s5, %s181_s7, [#allocation8], %s177_s18, 0  }
  0x11   : > { %s66_s13 = scalar_lea.hbm %s257_s1, 24  ;;  %s72_s14 = sshll.u32 %s65_s10, 4  ;;  %s73_s14 = int_to_ptr.hbm [resolvable:$true] %s72_s14 }
  0x12   : > { %s74_s15 = sshll.u32 %s66_s13, 4  ;;  %s182_s16 = smov [#allocation2 + $0x3]   ;;  %s75_s15 = int_to_ptr.hbm [resolvable:$true] %s74_s15 }
  0x13   : > { %s183_s17 = smov [#allocation9]  }
  0x14   : > { %129 = dma.general (%p133_p1), %s73_s14, 128, %s75_s15, %s182_s16, %s183_s17, [#allocation10], %s177_s18, 0  }
  0x15   : > { %164 = dma.done.wait (%p133_p1), [#allocation2 + $0x1], 128 }
  0x16   : > { %166 = vsyncadd (%p133_p1), [#allocation2 + $0x1], 4294967168 }
  0x17   : > { %168 = dma.done.wait (%p133_p1), [#allocation2 + $0x3], 128 }
  0x18   : > { %170 = vsyncadd (%p133_p1), [#allocation2 + $0x3], 4294967168  ;;  %s11_s6 = sadd.s32 1, %s173_s6  }
  0x19   : > { %p8_p2 = scmp.ge.s32.totalorder %s11_s6, 2  }
  0x1b   :  { %10 = sbr.rel (!%p8_p2) target bundleno = 1 (0x1), region = 39 }
  0x20   :  { %84 = vsyncmov [#allocation2] }
  0x23   :  { %s85_s19 = vpop.sfrf %84 }
  0x24   :  { %p118_p3 = scmp.ne.s32.totalorder %s85_s19, 0 }
  0x26   :  { %89 = shalt.err (%p118_p3)  }
  0x27   :  { %91 = vsyncmov [#allocation2 + $0x1] }
  0x2a   :  { %s92_s18 = vpop.sfrf %91 }
  0x2b   :  { %p119_p4 = scmp.ne.s32.totalorder %s92_s18, 0 }
  0x2d   :  { %96 = shalt.err (%p119_p4)  }
  0x2e   :  { %98 = vsyncmov [#allocation2 + $0x2] }
  0x31   :  { %s99_s20 = vpop.sfrf %98 }
  0x32   :  { %p120_p5 = scmp.ne.s32.totalorder %s99_s20, 0 }
  0x34   :  { %103 = shalt.err (%p120_p5)  }
  0x35   :  { %105 = vsyncmov [#allocation2 + $0x3] }
  0x38   :  { %s106_s21 = vpop.sfrf %105 }
  0x39   :  { %p121_p6 = scmp.ne.s32.totalorder %s106_s21, 0 }
  0x3b   :  { %110 = shalt.err (%p121_p6)  }

</bundles_post_ra>
